<compile_context>
chip_gen: v7x
topology: tpu7x:2x2x1
jax: 0.10.0
libtpu: 0.0.40
codegen_flags: <defaults>
</compile_context>

<pallas_src>
import functools

import jax
import jax.numpy as jnp
from jax import lax
from jax.experimental import pallas as pl
from jax.experimental.pallas import tpu as pltpu

WIDTH = 32
DEPTH = 2
TM_MAX = 4096   # batch-tile upper bound (lanes) -> (3, 4096) f32 block = 48 KiB
CHUNK = 512     # inner sub-chunk (lanes) processed per loop iteration

_WEIGHT_ORDER = ("w_in", "b_in", "blk_w", "blk_b", "w_out", "b_out")


# ---------------------------------------------------------------------------
# Kernel
# ---------------------------------------------------------------------------
def _flow_kernel(txy_ref,        # (3, TM)   rows [T, X, Y], batch on lanes
                 w_in_ref,       # (32, 3)   fused input weight (col 0 = T weight)
                 b_in_ref,       # (32, 1)
                 blk_w_ref,      # (4, 32, 32) [blk0.W, blk0.V, blk1.W, blk1.V]^T
                 blk_b_ref,      # (4, 32, 1)
                 w_out_ref,      # (2, 32)
                 b_out_ref,      # (2, 1)
                 out_ref,        # (3, TM)
                 *, chunk, num_chunks):
    # T passes straight through: one full-width (lane-dense) store for row 0.
    out_ref[0:1, :] = txy_ref[0:1, :]

    # Loop-invariant weight loads (hoisted; tiny).
    w_in = w_in_ref[...]
    b_in = b_in_ref[...]
    blk_w = blk_w_ref[...]
    blk_b = blk_b_ref[...]
    w_out = w_out_ref[...]
    b_out = b_out_ref[...]

    def body(c, carry):
        start = pl.multiple_of(c * chunk, 128)
        txy = txy_ref[:, pl.ds(start, chunk)]           # (3, chunk)
        xy = txy[1:3, :]                                 # (2, chunk)

        # h = relu(W_fused @ [T;X;Y] + b)   -> (32, chunk), batch on lanes
        h = jnp.dot(w_in, txy, preferred_element_type=jnp.float32)
        h = jnp.maximum(h + b_in, 0.0)

        # residual blocks: h = tanh(h + V(tanh(W(h))))
        # (jnp.tanh expected to lower to a single EUP op; see header note.)
        for d in range(DEPTH):
            inner = jnp.tanh(
                jnp.dot(blk_w[2 * d], h, preferred_element_type=jnp.float32)
                + blk_b[2 * d])
            h = jnp.tanh(
                h
                + jnp.dot(blk_w[2 * d + 1], inner,
                          preferred_element_type=jnp.float32)
                + blk_b[2 * d + 1])

        # A = XY + V(h)   -> (2, chunk)
        a = xy + jnp.dot(w_out, h, preferred_element_type=jnp.float32) + b_out

        # sliced store of the A rows (rows 1:3) for this chunk
        out_ref[1:3, pl.ds(start, chunk)] = a.astype(out_ref.dtype)
        return carry

    if num_chunks == 1:
        body(0, 0)
    else:
        lax.fori_loop(0, num_chunks, body, 0, unroll=True)


# ---------------------------------------------------------------------------
# Tiling / hardware helpers
# ---------------------------------------------------------------------------
def _round_up(x, m):
    return (x + m - 1) // m * m


def _num_tensorcores():
    """Best-effort TensorCores-per-chip; 1 (no forced grid split) if unknown."""
    try:
        info = pltpu.get_tpu_info()
        for attr in ("num_cores", "tensorcores_per_chip", "num_tensorcores"):
            v = getattr(info, attr, None)
            if isinstance(v, int) and 1 <= v <= 8:
                return v
    except Exception:
        pass
    try:
        dev = jax.devices()[0]
        if getattr(dev, "platform", "") == "tpu":
            for attr in ("num_cores", "core_count"):
                v = getattr(dev, attr, None)
                if isinstance(v, int) and 1 <= v <= 8:
                    return v
    except Exception:
        pass
    return 1


def _choose_tiling(n, num_cores=1, tm_max=TM_MAX, chunk=CHUNK):
    """Padded batch, batch tile (mult of 128) and inner chunk size."""
    n_pad = _round_up(max(n, 1), 128)
    steps = max(1, -(-n_pad // tm_max))
    if num_cores > 1:
        # balanced work across TensorCores under dimension_semantics=("parallel",)
        steps = _round_up(steps, num_cores)
    tm = _round_up(-(-n_pad // steps), 128)
    if tm >= chunk:
        tm = _round_up(tm, chunk)       # inner loop covers the tile exactly
    else:
        chunk = tm                      # small batch: single chunk = tile
    n_pad = steps * tm
    return n_pad, tm, chunk


def _full_spec(shape):
    # full-array block, same block for every grid step
    return pl.BlockSpec(shape, lambda i: (0,) * len(shape))


# ---------------------------------------------------------------------------
# Parameter packing (one-time, outside the per-call jitted path)
# ---------------------------------------------------------------------------
def pack_params(params):
    """Pack raw params into the feature-major (left-multiply) kernel layout."""
    return {
        # Fused input weight; row order of TXY is [T, X, Y].
        "w_in": jnp.concatenate([params["b_w"], params["w_in"]], axis=0).T,  # (32, 3)
        "b_in": params["b_b"].T,                                             # (32, 1)
        "blk_w": jnp.stack([params["blk0_w"].T, params["blk0_v"].T,
                            params["blk1_w"].T, params["blk1_v"].T]),        # (4, 32, 32)
        "blk_b": jnp.stack([params["blk0_wb"].T, params["blk0_vb"].T,
                            params["blk1_wb"].T, params["blk1_vb"].T]),      # (4, 32, 1)
        "w_out": params["v_w"].T,                                            # (2, 32)
        "b_out": params["v_b"].T,                                            # (2, 1)
    }


# ---------------------------------------------------------------------------
# Forward wrappers
# ---------------------------------------------------------------------------
@functools.partial(jax.jit, static_argnames=("num_cores", "batch_major"))
def _forward(txy, packed, *, num_cores, batch_major):
    if batch_major:
        # Compatibility path: one extra HBM pass each way. Prefer the
        # feature-major entry point (flow_forward_fm) for large N.
        txy = txy.T                                   # (3, N)

    n = txy.shape[1]
    n_pad, tm, chunk = _choose_tiling(n, num_cores)
    num_chunks = tm // chunk

    x = txy if n_pad == n else jnp.pad(txy, ((0, 0), (0, n_pad - n)))
    weight_args = [packed[k] for k in _WEIGHT_ORDER]

    grid_spec = pltpu.PrefetchScalarGridSpec(
        num_scalar_prefetch=0,
        grid=(n_pad // tm,),
        in_specs=[pl.BlockSpec((3, tm), lambda i: (0, i))]
        + [_full_spec(w.shape) for w in weight_args],
        out_specs=pl.BlockSpec((3, tm), lambda i: (0, i)),
    )

    out_fm = pl.pallas_call(
        functools.partial(_flow_kernel, chunk=chunk, num_chunks=num_chunks),
        out_shape=jax.ShapeDtypeStruct((3, n_pad), jnp.float32),
        grid_spec=grid_spec,
        compiler_params=pltpu.CompilerParams(
            dimension_semantics=("parallel",)),
    )(x, *weight_args)

    out_fm = out_fm[:, :n]
    return out_fm.T if batch_major else out_fm


def flow_forward(txy, packed_params, num_cores=None):
    """Module-compatible entry point. txy: (N, 3) float32 -> (N, 3)."""
    if num_cores is None:
        num_cores = _num_tensorcores()
    return _forward(txy, packed_params, num_cores=num_cores, batch_major=True)


def flow_forward_fm(txy_fm, packed_params, num_cores=None):
    """Feature-major entry point (no wrapper HBM passes). (3, N) -> (3, N)."""
    if num_cores is None:
        num_cores = _num_tensorcores()
    return _forward(txy_fm, packed_params, num_cores=num_cores,
                    batch_major=False)


# ---------------------------------------------------------------------------
# Init + pure-JAX reference (for verification)
# ---------------------------------------------------------------------------
def init_params(key):
    """Deterministic init matching the PyTorch module's parameter shapes.

    Weights stored pre-transposed as (fan_in, fan_out); biases as (1, fan_out).
    """
    def linear(key, fan_in, fan_out, bias=True):
        kw, kb = jax.random.split(key)
        bound = 1.0 / jnp.sqrt(fan_in)
        w = jax.random.uniform(kw, (fan_in, fan_out), jnp.float32, -bound, bound)
        if not bias:
            return w, None
        b = jax.random.uniform(kb, (1, fan_out), jnp.float32, -bound, bound)
        return w, b

    keys = jax.random.split(key, 4 + 2 * DEPTH)
    params = {}
    params["w_in"], _ = linear(keys[0], 2, WIDTH, bias=False)          # Linear(2, 32, bias=False)
    params["b_w"], params["b_b"] = linear(keys[1], 1, WIDTH)           # Linear(1, 32)
    for d in range(DEPTH):
        w, wb = linear(keys[2 + 2 * d], WIDTH, WIDTH)                  # Block.W
        v, vb = linear(keys[3 + 2 * d], WIDTH, WIDTH)                  # Block.V
        params[f"blk{d}_w"], params[f"blk{d}_wb"] = w, wb
        params[f"blk{d}_v"], params[f"blk{d}_vb"] = v, vb
    params["v_w"], params["v_b"] = linear(keys[2 + 2 * DEPTH], WIDTH, 2)  # Linear(32, 2)
    return params


def flow_reference(txy, p):
    """Pure-JAX reference of NeuralFlow.forward."""
    t = txy[:, 0:1]
    xy = txy[:, 1:3]
    h = jax.nn.relu(xy @ p["w_in"] + t @ p["b_w"] + p["b_b"])
    for d in range(DEPTH):
        inner = jnp.tanh(h @ p[f"blk{d}_w"] + p[f"blk{d}_wb"])
        h = jnp.tanh(h + inner @ p[f"blk{d}_v"] + p[f"blk{d}_vb"])
    a = xy + h @ p["v_w"] + p["v_b"]
    return jnp.concatenate([t, a], axis=-1)


# ---------------------------------------------------------------------------
if __name__ == "__main__":
    key = jax.random.PRNGKey(0)
    k_param, k_x1, k_x2 = jax.random.split(key, 3)

    params = init_params(k_param)
    packed = pack_params(params)

    # Small batch (module-compatible (N, 3) path + feature-major path).
    txy = jax.random.normal(k_x1, (16, 3), dtype=jnp.float32)
    out = jax.block_until_ready(flow_forward(txy, packed))
    ref = flow_reference(txy, params)
    assert out.shape == (16, 3)
    assert jnp.allclose(out, ref, atol=1e-4, rtol=1e-4), (
        f"max abs err {jnp.max(jnp.abs(out - ref))}")

    out_fm = jax.block_until_ready(flow_forward_fm(txy.T, packed))
    assert out_fm.shape == (3, 16)
    assert jnp.allclose(out_fm.T, ref, atol=1e-4, rtol=1e-4), (
        f"max abs err {jnp.max(jnp.abs(out_fm.T - ref))}")

    # Non-aligned batch: exercises padding + the multi-chunk inner loop.
    txy2 = jax.random.normal(k_x2, (1000, 3), dtype=jnp.float32)
    out2 = jax.block_until_ready(flow_forward(txy2, packed))
    ref2 = flow_reference(txy2, params)
    assert out2.shape == (1000, 3)
    assert jnp.allclose(out2, ref2, atol=1e-4, rtol=1e-4), (
        f"max abs err {jnp.max(jnp.abs(out2 - ref2))}")

    print("KERNEL_OK")
</pallas_src>

<mosaic_0001>
module attributes {stable_mosaic.version = 11 : i64} {
  func.func @_flow_kernel(%arg0: i32, %arg1: memref<3x128xf32, #tpu.memory_space<vmem>>, %arg2: memref<32x3xf32, #tpu.memory_space<vmem>>, %arg3: memref<32x1xf32, #tpu.memory_space<vmem>>, %arg4: memref<4x32x32xf32, #tpu.memory_space<vmem>>, %arg5: memref<4x32x1xf32, #tpu.memory_space<vmem>>, %arg6: memref<2x32xf32, #tpu.memory_space<vmem>>, %arg7: memref<2x1xf32, #tpu.memory_space<vmem>>, %arg8: memref<3x128xf32, #tpu.memory_space<vmem>>) attributes {dimension_semantics = [#tpu.dimension_semantics<parallel>], iteration_bounds = array<i64: 1>, scalar_prefetch = 0 : i64, scratch_operands = 0 : i64, tpu.core_type = #tpu.core_type<tc>, window_params = [{transform_indices = @transform_0, window_bounds = array<i64: 3, 128>}, {pipeline_mode = #tpu.pipeline_mode<synchronous>, transform_indices = @transform_1, window_bounds = array<i64: 32, 3>}, {pipeline_mode = #tpu.pipeline_mode<synchronous>, transform_indices = @transform_2, window_bounds = array<i64: 32, 1>}, {pipeline_mode = #tpu.pipeline_mode<synchronous>, transform_indices = @transform_3, window_bounds = array<i64: 4, 32, 32>}, {pipeline_mode = #tpu.pipeline_mode<synchronous>, transform_indices = @transform_4, window_bounds = array<i64: 4, 32, 1>}, {pipeline_mode = #tpu.pipeline_mode<synchronous>, transform_indices = @transform_5, window_bounds = array<i64: 2, 32>}, {pipeline_mode = #tpu.pipeline_mode<synchronous>, transform_indices = @transform_6, window_bounds = array<i64: 2, 1>}, {transform_indices = @transform_7, window_bounds = array<i64: 3, 128>}]} {
    %c0 = arith.constant 0 : index
    %c0_0 = arith.constant 0 : index
    %0 = vector.load %arg1[%c0, %c0_0] : memref<3x128xf32, #tpu.memory_space<vmem>>, vector<1x128xf32>
    %c0_1 = arith.constant 0 : index
    %c0_2 = arith.constant 0 : index
    %1 = vector.load %arg8[%c0_1, %c0_2] : memref<3x128xf32, #tpu.memory_space<vmem>>, vector<1x128xf32>
    tpu.vector_store %arg8[%c0_1, %c0_2], %0 {strides = array<i32>} : memref<3x128xf32, #tpu.memory_space<vmem>>, vector<1x128xf32>,
    %c0_3 = arith.constant 0 : index
    %c0_4 = arith.constant 0 : index
    %2 = vector.load %arg2[%c0_3, %c0_4] : memref<32x3xf32, #tpu.memory_space<vmem>>, vector<32x3xf32>
    %c0_5 = arith.constant 0 : index
    %c0_6 = arith.constant 0 : index
    %3 = vector.load %arg3[%c0_5, %c0_6] : memref<32x1xf32, #tpu.memory_space<vmem>>, vector<32x1xf32>
    %c0_7 = arith.constant 0 : index
    %c0_8 = arith.constant 0 : index
    %c0_9 = arith.constant 0 : index
    %4 = vector.load %arg4[%c0_7, %c0_8, %c0_9] : memref<4x32x32xf32, #tpu.memory_space<vmem>>, vector<4x32x32xf32>
    %c0_10 = arith.constant 0 : index
    %c0_11 = arith.constant 0 : index
    %c0_12 = arith.constant 0 : index
    %5 = vector.load %arg5[%c0_10, %c0_11, %c0_12] : memref<4x32x1xf32, #tpu.memory_space<vmem>>, vector<4x32x1xf32>
    %c0_13 = arith.constant 0 : index
    %c0_14 = arith.constant 0 : index
    %6 = vector.load %arg6[%c0_13, %c0_14] : memref<2x32xf32, #tpu.memory_space<vmem>>, vector<2x32xf32>
    %c0_15 = arith.constant 0 : index
    %c0_16 = arith.constant 0 : index
    %7 = vector.load %arg7[%c0_15, %c0_16] : memref<2x1xf32, #tpu.memory_space<vmem>>, vector<2x1xf32>
    %c0_i32 = arith.constant 0 : i32
    %8 = tpu.assume_multiple %c0_i32, 128 : i32
    %c0_17 = arith.constant 0 : index
    %9 = arith.index_cast %8 : i32 to index
    %10 = vector.load %arg1[%c0_17, %9] : memref<3x128xf32, #tpu.memory_space<vmem>>, vector<3x128xf32>
    %11 = vector.extract_strided_slice %10 {offsets = [1, 0], sizes = [2, 128], strides = [1, 1]} : vector<3x128xf32> to vector<2x128xf32>
    %cst = arith.constant dense<0.000000e+00> : vector<32x128xf32>
    %12 = tpu.matmul %2, %10, %cst {dimension_numbers = #tpu.dot_dimension_numbers<[1], [0], [0], [1], [0, 0, 1, 1], [], []>} : vector<32x3xf32>, vector<3x128xf32>, vector<32x128xf32> -> vector<32x128xf32>
    %13 = vector.broadcast %3 : vector<32x1xf32> to vector<32x128xf32>
    %14 = arith.addf %12, %13 : vector<32x128xf32>
    %cst_18 = arith.constant 0.000000e+00 : f32
    %15 = vector.broadcast %cst_18 : f32 to vector<32x128xf32>
    %16 = arith.maximumf %14, %15 : vector<32x128xf32>
    %17 = vector.extract_strided_slice %4 {offsets = [0, 0, 0], sizes = [1, 32, 32], strides = [1, 1, 1]} : vector<4x32x32xf32> to vector<1x32x32xf32>
    %18 = vector.shape_cast %17 : vector<1x32x32xf32> to vector<32x32xf32>
    %cst_19 = arith.constant dense<0.000000e+00> : vector<32x128xf32>
    %19 = tpu.matmul %18, %16, %cst_19 {dimension_numbers = #tpu.dot_dimension_numbers<[1], [0], [0], [1], [0, 0, 1, 1], [], []>} : vector<32x32xf32>, vector<32x128xf32>, vector<32x128xf32> -> vector<32x128xf32>
    %20 = vector.extract_strided_slice %5 {offsets = [0, 0, 0], sizes = [1, 32, 1], strides = [1, 1, 1]} : vector<4x32x1xf32> to vector<1x32x1xf32>
    %21 = vector.shape_cast %20 : vector<1x32x1xf32> to vector<32x1xf32>
    %22 = vector.broadcast %21 : vector<32x1xf32> to vector<32x128xf32>
    %23 = arith.addf %19, %22 : vector<32x128xf32>
    %24 = math.tanh %23 : vector<32x128xf32>
    %25 = vector.extract_strided_slice %4 {offsets = [1, 0, 0], sizes = [1, 32, 32], strides = [1, 1, 1]} : vector<4x32x32xf32> to vector<1x32x32xf32>
    %26 = vector.shape_cast %25 : vector<1x32x32xf32> to vector<32x32xf32>
    %cst_20 = arith.constant dense<0.000000e+00> : vector<32x128xf32>
    %27 = tpu.matmul %26, %24, %cst_20 {dimension_numbers = #tpu.dot_dimension_numbers<[1], [0], [0], [1], [0, 0, 1, 1], [], []>} : vector<32x32xf32>, vector<32x128xf32>, vector<32x128xf32> -> vector<32x128xf32>
    %28 = arith.addf %16, %27 : vector<32x128xf32>
    %29 = vector.extract_strided_slice %5 {offsets = [1, 0, 0], sizes = [1, 32, 1], strides = [1, 1, 1]} : vector<4x32x1xf32> to vector<1x32x1xf32>
    %30 = vector.shape_cast %29 : vector<1x32x1xf32> to vector<32x1xf32>
    %31 = vector.broadcast %30 : vector<32x1xf32> to vector<32x128xf32>
    %32 = arith.addf %28, %31 : vector<32x128xf32>
    %33 = math.tanh %32 : vector<32x128xf32>
    %34 = vector.extract_strided_slice %4 {offsets = [2, 0, 0], sizes = [1, 32, 32], strides = [1, 1, 1]} : vector<4x32x32xf32> to vector<1x32x32xf32>
    %35 = vector.shape_cast %34 : vector<1x32x32xf32> to vector<32x32xf32>
    %cst_21 = arith.constant dense<0.000000e+00> : vector<32x128xf32>
    %36 = tpu.matmul %35, %33, %cst_21 {dimension_numbers = #tpu.dot_dimension_numbers<[1], [0], [0], [1], [0, 0, 1, 1], [], []>} : vector<32x32xf32>, vector<32x128xf32>, vector<32x128xf32> -> vector<32x128xf32>
    %37 = vector.extract_strided_slice %5 {offsets = [2, 0, 0], sizes = [1, 32, 1], strides = [1, 1, 1]} : vector<4x32x1xf32> to vector<1x32x1xf32>
    %38 = vector.shape_cast %37 : vector<1x32x1xf32> to vector<32x1xf32>
    %39 = vector.broadcast %38 : vector<32x1xf32> to vector<32x128xf32>
    %40 = arith.addf %36, %39 : vector<32x128xf32>
    %41 = math.tanh %40 : vector<32x128xf32>
    %42 = vector.extract_strided_slice %4 {offsets = [3, 0, 0], sizes = [1, 32, 32], strides = [1, 1, 1]} : vector<4x32x32xf32> to vector<1x32x32xf32>
    %43 = vector.shape_cast %42 : vector<1x32x32xf32> to vector<32x32xf32>
    %cst_22 = arith.constant dense<0.000000e+00> : vector<32x128xf32>
    %44 = tpu.matmul %43, %41, %cst_22 {dimension_numbers = #tpu.dot_dimension_numbers<[1], [0], [0], [1], [0, 0, 1, 1], [], []>} : vector<32x32xf32>, vector<32x128xf32>, vector<32x128xf32> -> vector<32x128xf32>
    %45 = arith.addf %33, %44 : vector<32x128xf32>
    %46 = vector.extract_strided_slice %5 {offsets = [3, 0, 0], sizes = [1, 32, 1], strides = [1, 1, 1]} : vector<4x32x1xf32> to vector<1x32x1xf32>
    %47 = vector.shape_cast %46 : vector<1x32x1xf32> to vector<32x1xf32>
    %48 = vector.broadcast %47 : vector<32x1xf32> to vector<32x128xf32>
    %49 = arith.addf %45, %48 : vector<32x128xf32>
    %50 = math.tanh %49 : vector<32x128xf32>
    %cst_23 = arith.constant dense<0.000000e+00> : vector<2x128xf32>
    %51 = tpu.matmul %6, %50, %cst_23 {dimension_numbers = #tpu.dot_dimension_numbers<[1], [0], [0], [1], [0, 0, 1, 1], [], []>} : vector<2x32xf32>, vector<32x128xf32>, vector<2x128xf32> -> vector<2x128xf32>
    %52 = arith.addf %11, %51 : vector<2x128xf32>
    %53 = vector.broadcast %7 : vector<2x1xf32> to vector<2x128xf32>
    %54 = arith.addf %52, %53 : vector<2x128xf32>
    %c1 = arith.constant 1 : index
    %55 = arith.index_cast %8 : i32 to index
    %56 = vector.load %arg8[%c1, %55] : memref<3x128xf32, #tpu.memory_space<vmem>>, vector<2x128xf32>
    tpu.vector_store %arg8[%c1, %55], %54 {strides = array<i32>} : memref<3x128xf32, #tpu.memory_space<vmem>>, vector<2x128xf32>,
    return
  }
  func.func @transform_0(%arg0: i32) -> (i32, i32) {
    %c0_i32 = arith.constant 0 : i32
    %c0_i32_0 = arith.constant 0 : i32
    return %c0_i32, %arg0 : i32, i32
  }
  func.func @transform_1(%arg0: i32) -> (i32, i32) {
    %c0_i32 = arith.constant 0 : i32
    %c0_i32_0 = arith.constant 0 : i32
    %c0_i32_1 = arith.constant 0 : i32
    return %c0_i32, %c0_i32_0 : i32, i32
  }
  func.func @transform_2(%arg0: i32) -> (i32, i32) {
    %c0_i32 = arith.constant 0 : i32
    %c0_i32_0 = arith.constant 0 : i32
    %c0_i32_1 = arith.constant 0 : i32
    return %c0_i32, %c0_i32_0 : i32, i32
  }
  func.func @transform_3(%arg0: i32) -> (i32, i32, i32) {
    %c0_i32 = arith.constant 0 : i32
    %c0_i32_0 = arith.constant 0 : i32
    %c0_i32_1 = arith.constant 0 : i32
    %c0_i32_2 = arith.constant 0 : i32
    return %c0_i32, %c0_i32_0, %c0_i32_1 : i32, i32, i32
  }
  func.func @transform_4(%arg0: i32) -> (i32, i32, i32) {
    %c0_i32 = arith.constant 0 : i32
    %c0_i32_0 = arith.constant 0 : i32
    %c0_i32_1 = arith.constant 0 : i32
    %c0_i32_2 = arith.constant 0 : i32
    return %c0_i32, %c0_i32_0, %c0_i32_1 : i32, i32, i32
  }
  func.func @transform_5(%arg0: i32) -> (i32, i32) {
    %c0_i32 = arith.constant 0 : i32
    %c0_i32_0 = arith.constant 0 : i32
    %c0_i32_1 = arith.constant 0 : i32
    return %c0_i32, %c0_i32_0 : i32, i32
  }
  func.func @transform_6(%arg0: i32) -> (i32, i32) {
    %c0_i32 = arith.constant 0 : i32
    %c0_i32_0 = arith.constant 0 : i32
    %c0_i32_1 = arith.constant 0 : i32
    return %c0_i32, %c0_i32_0 : i32, i32
  }
  func.func @transform_7(%arg0: i32) -> (i32, i32) {
    %c0_i32 = arith.constant 0 : i32
    %c0_i32_0 = arith.constant 0 : i32
    return %c0_i32, %arg0 : i32, i32
  }
}

</mosaic_0001>

<bundles_post_ra>
// kernel: _forward.1
= control target key start
LH: loop header
LB: loop body
LE: loop exit
PB: predicated region body
PF: predicated region fallthrough
CT: control target
= control target key end

     0   :  { %vm104_vm0 = vcmask 1042432   ;;  %vm91_vm1 = vcmask 23552   ;;  %v1002_v3 = vmov 0   ;;  %vm217_vm2 = vcmask 261120   ;;  %s1226_s0 = inlined_call_operand.vmem [shape: f32[3,128], index: 0, kind: input, shape index: {}]   ;;  %s1227_s7 = inlined_call_operand.vmem [shape: f32[3,128], index: 7, kind: output, shape index: {}]   ;;  %s1228_s1 = inlined_call_operand.vmem [shape: f32[32,3], index: 1, kind: input, shape index: {}]   ;;  %s1229_s2 = inlined_call_operand.vmem [shape: f32[32,1], index: 2, kind: input, shape index: {}]   ;;  %s1230_s4 = inlined_call_operand.vmem [shape: f32[4,32,1], index: 4, kind: input, shape index: {}]   ;;  %s1231_s6 = inlined_call_operand.vmem [shape: f32[2,1], index: 6, kind: input, shape index: {}]   ;;  %s1232_s3 = inlined_call_operand.vmem [shape: f32[4,32,32], index: 3, kind: input, shape index: {}]   ;;  %s1233_s5 = inlined_call_operand.vmem [shape: f32[2,32], index: 5, kind: input, shape index: {}]  }
   0x1   :  { %v26_v0 = vld [vmem:[%s1226_s0] sm:$0x1]  ;;  %968 = vset.pattern.permute.xlu0 %v1002_v3  ;;  %969 = vset.pattern.permute.xlu1 %v1002_v3  ;;  %v29_v4 = vld [vmem:[%s1228_s1 + $0x8] sm:$0xff]  ;;  %v30_v5 = vld [vmem:[%s1228_s1 + $0x10] sm:$0xff]  ;;  %vm1004_vm3 = vmmov 0  }
   0x2   :  { %v1052_v1 = vld [vmem:[%s1226_s0] sm:$0x7]  ;;  %27 = vst [vmem:[%s1227_s7] sm:$0x1] %v26_v0  ;;  %v34_v7 = vld [vmem:[%s1229_s2 + $0x10] sm:$0xff]  ;;  %v31_v8 = vld [vmem:[%s1228_s1 + $0x18] sm:$0xff] }
   0x3   :  { %v28_v2 = vld [vmem:[%s1228_s1] sm:$0xff]  ;;  %851 = vmatprep.subr.msk.mxu0 %vm104_vm0, %v1052_v1  ;;  %v33_v9 = vld [vmem:[%s1229_s2 + $0x8] sm:$0xff]  ;;  %83 = vperm.xlu1 %969, %v34_v7   ;;  %v35_v10 = vld [vmem:[%s1229_s2 + $0x18] sm:$0xff] }
   0x4   :  { %853 = vmatprep.mubr.msk.f32.mxu0 %vm91_vm1, %v28_v2  ;;  %852 = vmatpush3.msk.msra.mxu0 %vm104_vm0, %v1052_v1  ;;  %v32_v6 = vld [vmem:[%s1229_s2] sm:$0xff]  ;;  %v53_v12 = vld [vmem:[%s1230_s4 + $0x8] sm:$0xff]  ;;  %v54_v13 = vld [vmem:[%s1230_s4 + $0x10] sm:$0xff] }
   0x5   :  { %854 = vmatmul.mubr.msk.f32.vlgmr.msra.gmra.mrb[0].mxu0 %vm91_vm1, %v29_v4  ;;  %73 = vperm.xlu0 %968, %v32_v6   ;;  %v52_v11 = vld [vmem:[%s1230_s4] sm:$0xff]  ;;  %v55_v14 = vld [vmem:[%s1230_s4 + $0x18] sm:$0xff]  ;;  %v57_v16 = vld [vmem:[%s1230_s4 + $0x28] sm:$0xff] }
   0x6   :  { %856 = vmatprep.mubr.msk.f32.mxu0 %vm91_vm1, %v30_v5  ;;  %v56_v15 = vld [vmem:[%s1230_s4 + $0x20] sm:$0xff]  ;;  %v58_v17 = vld [vmem:[%s1230_s4 + $0x30] sm:$0xff]  ;;  %v59_v18 = vld [vmem:[%s1230_s4 + $0x38] sm:$0xff] }
   0x7   :  { %88 = vperm.xlu1 %969, %v35_v10   ;;  %v60_v19 = vld [vmem:[%s1230_s4 + $0x40] sm:$0xff]  ;;  %v61_v20 = vld [vmem:[%s1230_s4 + $0x48] sm:$0xff]  ;;  %v62_v21 = vld [vmem:[%s1230_s4 + $0x50] sm:$0xff] }
   0x8   :  { %v63_v22 = vld [vmem:[%s1230_s4 + $0x58] sm:$0xff]  ;;  %v64_v23 = vld [vmem:[%s1230_s4 + $0x60] sm:$0xff]  ;;  %v65_v24 = vld [vmem:[%s1230_s4 + $0x68] sm:$0xff] }
   0x9   :  { %857 = vmatmul.mubr.msk.f32.gmra.mrb[2].mxu0 %vm91_vm1, %v31_v8  ;;  %78 = vperm.xlu0 %968, %v33_v9   ;;  %v66_v25 = vld [vmem:[%s1230_s4 + $0x70] sm:$0xff]  ;;  %v67_v26 = vld [vmem:[%s1230_s4 + $0x78] sm:$0xff]  ;;  %v69_v27 = vld [vmem:[%s1231_s6] sm:$0x3] }
   0xa   :  { %v36_v28 = vld [vmem:[%s1232_s3] sm:$0xff]  ;;  %v37_v47 = vld [vmem:[%s1232_s3 + $0x8] sm:$0xff]  ;;  %v38_v48 = vld [vmem:[%s1232_s3 + $0x10] sm:$0xff] }
   0xb   :  { %204 = vperm.xlu1 %969, %v53_v12   ;;  %867 = vmatprep.mubr.msk.f32.mxu1 %vm217_vm2, %v36_v28  ;;  %v39_v49 = vld [vmem:[%s1232_s3 + $0x18] sm:$0xff]  ;;  %v40_v50 = vld [vmem:[%s1232_s3 + $0x20] sm:$0xff]  ;;  %v41_v6 = vld [vmem:[%s1232_s3 + $0x28] sm:$0xff] }
   0xc   :  { %881 = vmatprep.mubr.msk.f32.mxu0 %vm217_vm2, %v40_v50  ;;  %v42_v7 = vld [vmem:[%s1232_s3 + $0x30] sm:$0xff]  ;;  %v43_v8 = vld [vmem:[%s1232_s3 + $0x38] sm:$0xff]  ;;  %v44_v9 = vld [vmem:[%s1232_s3 + $0x40] sm:$0xff] }
   0xd   :  { %199 = vperm.xlu0 %968, %v52_v11  }
   0xf   :  { %214 = vperm.xlu1 %969, %v55_v14  }
  0x11   :  { %209 = vperm.xlu0 %968, %v54_v13  }
  0x13   :  { %427 = vperm.xlu1 %969, %v57_v16  }
  0x15   :  { %422 = vperm.xlu0 %968, %v56_v15  }
  0x17   :  { %437 = vperm.xlu1 %969, %v59_v18  }
  0x19   :  { %432 = vperm.xlu0 %968, %v58_v17  }
  0x1b   :  { %455 = vperm.xlu1 %969, %v61_v20  }
  0x1d   :  { %450 = vperm.xlu0 %968, %v60_v19  }
  0x1f   :  { %465 = vperm.xlu1 %969, %v63_v22  }
  0x21   :  { %460 = vperm.xlu0 %968, %v62_v21  }
  0x23   :  { %677 = vperm.xlu1 %969, %v65_v24  }
  0x25   :  { %672 = vperm.xlu0 %968, %v64_v23  }
  0x27   :  { %687 = vperm.xlu1 %969, %v67_v26  }
  0x29   :  { %682 = vperm.xlu0 %968, %v66_v25  }
  0x2d   :  { %777 = vperm.xlu0 %968, %v69_v27  }
  0x82   :  { %v84_v30 = vpop.permute.xlu1 %83 }
  0x84   :  { %v74_v29 = vpop.permute.xlu0 %73 }
  0x86   :  { %v89_v37 = vpop.permute.xlu1 %88 }
  0x88   :  { %v79_v31 = vpop.permute.xlu0 %78 }
  0x8a   :  { %v205_v51 = vpop.permute.xlu1 %204 }
  0x8c   :  { %v200_v52 = vpop.permute.xlu0 %199 }
  0x8e   :  { %v215_v57 = vpop.permute.xlu1 %214 }
  0x90   :  { %v210_v59 = vpop.permute.xlu0 %209 }
  0x92   :  { %v428_v10 = vpop.permute.xlu1 %427 }
  0x94   :  { %v423_v12 = vpop.permute.xlu0 %422 }
  0x96   :  { %v438_v21 = vpop.permute.xlu1 %437 }
  0x98   :  { %v433_v23 = vpop.permute.xlu0 %432 }
  0xd8   :  { %v855_v32 = vpop.f32.mrb[0].mxu0 }
  0xd9   :  { %v1142_v33 = vadd.f32 %v855_v32, %v79_v31  ;;  %v174_v34 = vpop.f32.mrb[1].mxu0  ;;  %v45_v32 = vld [vmem:[%s1232_s3 + $0x48] sm:$0xff] }
  0xda   :  { %v1144_v35 = vadd.f32 %v174_v34, %v74_v29  ;;  %v47_v34 = vld [vmem:[%s1232_s3 + $0x58] sm:$0xff] }
  0xdb   :  { %v194_v36 = vmax.f32 %v1142_v33, 0.0  ;;  %v46_v33 = vld [vmem:[%s1232_s3 + $0x50] sm:$0xff] }
  0xdc   :  { %v193_v38 = vmax.f32 %v1144_v35, 0.0  ;;  %v858_v39 = vpop.f32.mrb[2].mxu0  ;;  %v48_v35 = vld [vmem:[%s1232_s3 + $0x60] sm:$0xff] }
  0xdd   :  { %v1148_v40 = vadd.f32 %v858_v39, %v89_v37  ;;  %v184_v41 = vpop.f32.mrb[3].mxu0  ;;  %v451_v37 = vpop.permute.xlu0 %450 }
  0xde   :  { %v1150_v42 = vadd.f32 %v184_v41, %v84_v30  ;;  %v926_v43 = vpack.c.bf16 %v194_v36, %v193_v38 }
  0xdf   :  { %v196_v44 = vmax.f32 %v1148_v40, 0.0 }
  0xe0   :  { %v195_v45 = vmax.f32 %v1150_v42, 0.0  ;;  %927 = vmatprep.subr.bf16.mxu1 %v926_v43 }
  0xe1   :  { %929 = vmatpush3.bf16.msra.mxu1 %v926_v43 }
  0xe2   :  { %v930_v46 = vpack.c.bf16 %v196_v44, %v195_v45 }
  0xe4   :  { %931 = vmatprep.subr.bf16.mxu1 %v930_v46 }
  0xe5   :  { %933 = vmatpush3.bf16.msra.mxu1 %v930_v46 }
  0xe8   :  { %868 = vmatmul.mubr.msk.f32.vlgmr.msra.gmra.mrb[0].mxu1 %vm217_vm2, %v37_v47 }
  0xe9   :  { %870 = vmatprep.mubr.msk.f32.mxu1 %vm217_vm2, %v38_v48 }
  0xec   :  { %871 = vmatmul.mubr.msk.f32.gmra.mrb[2].mxu1 %vm217_vm2, %v39_v49 }
  0xed   :  { %895 = vmatprep.mubr.msk.f32.mxu1 %vm217_vm2, %v44_v9 }
 0x1bb   :  { %v869_v53 = vpop.f32.mrb[0].mxu1 }
 0x1bc   :  { %v302_v54 = vadd.f32 %v869_v53, %v205_v51  ;;  %v296_v55 = vpop.f32.mrb[1].mxu1 }
 0x1bd   :  { %v297_v56 = vadd.f32 %v296_v55, %v200_v52  ;;  %v50_v55 = vld [vmem:[%s1232_s3 + $0x70] sm:$0xff] }
 0x1be   :  { %970 = vtanh.f32 %v302_v54  ;;  %v49_v54 = vld [vmem:[%s1232_s3 + $0x68] sm:$0xff] }
 0x1bf   :  { %972 = vtanh.f32 %v297_v56  ;;  %v872_v58 = vpop.f32.mrb[2].mxu1  ;;  %v51_v56 = vld [vmem:[%s1232_s3 + $0x78] sm:$0xff] }
 0x1c0   :  { %v312_v60 = vadd.f32 %v872_v58, %v215_v57  ;;  %v306_v61 = vpop.f32.mrb[3].mxu1  ;;  %v1003_v57 = vmov 0.0|0.0   ;;  %v1005_v58 = vmov 0.0  }
 0x1c1   :  { %v307_v62 = vadd.f32 %v306_v61, %v210_v59 }
 0x1c2   :  { %974 = vtanh.f32 %v312_v60 }
 0x1c3   :  { %976 = vtanh.f32 %v307_v62 }
 0x1c8   :  { %v971_v63 = vpop.eup %970 }
 0x1c9   :  { %v973_v0 = vpop.eup %972 }
 0x1ca   :  { %v934_v2 = vpack.c.bf16 %v971_v63, %v973_v0 }
 0x1cc   :  { %v975_v3 = vpop.eup %974  ;;  %935 = vmatprep.subr.bf16.mxu0 %v934_v2 }
 0x1cd   :  { %v977_v4 = vpop.eup %976  ;;  %937 = vmatpush3.bf16.msra.mxu0 %v934_v2 }
 0x1ce   :  { %v938_v5 = vpack.c.bf16 %v975_v3, %v977_v4 }
 0x1d0   :  { %939 = vmatprep.subr.bf16.mxu0 %v938_v5 }
 0x1d1   :  { %941 = vmatpush3.bf16.msra.mxu0 %v938_v5 }
 0x1d4   :  { %882 = vmatmul.mubr.msk.f32.vlgmr.msra.gmra.mrb[4].mxu0 %vm217_vm2, %v41_v6 }
 0x1d5   :  { %884 = vmatprep.mubr.msk.f32.mxu0 %vm217_vm2, %v42_v7 }
 0x1d8   :  { %885 = vmatmul.mubr.msk.f32.gmra.mrb[6].mxu0 %vm217_vm2, %v43_v8 }
 0x1d9   :  { %909 = vmatprep.mubr.msk.f32.mxu0 %vm217_vm2, %v48_v35 }
 0x2a7   :  { %v883_v11 = vpop.f32.mrb[4].mxu0 }
 0x2a8   :  { %v417_v13 = vadd.f32 %v883_v11, %v194_v36  ;;  %v397_v14 = vpop.f32.mrb[5].mxu0  ;;  %v456_v36 = vpop.permute.xlu1 %455 }
 0x2a9   :  { %v416_v15 = vadd.f32 %v397_v14, %v193_v38 }
 0x2aa   :  { %v441_v16 = vadd.f32 %v428_v10, %v417_v13 }
 0x2ab   :  { %v440_v17 = vadd.f32 %v423_v12, %v416_v15  ;;  %v886_v18 = vpop.f32.mrb[6].mxu0 }
 0x2ac   :  { %978 = vtanh.f32 %v441_v16  ;;  %v419_v19 = vadd.f32 %v886_v18, %v196_v44  ;;  %v407_v20 = vpop.f32.mrb[7].mxu0  ;;  %v466_v42 = vpop.permute.xlu1 %465  ;;  %v68_v18 = vld [vmem:[%s1233_s5] sm:$0x3] }
 0x2ad   :  { %980 = vtanh.f32 %v440_v17  ;;  %v418_v22 = vadd.f32 %v407_v20, %v195_v45  ;;  %v461_v44 = vpop.permute.xlu0 %460 }
 0x2ae   :  { %v443_v24 = vadd.f32 %v438_v21, %v419_v19 }
 0x2af   :  { %v442_v25 = vadd.f32 %v433_v23, %v418_v22 }
 0x2b0   :  { %982 = vtanh.f32 %v443_v24  ;;  %v678_v59 = vpop.permute.xlu1 %677 }
 0x2b1   :  { %984 = vtanh.f32 %v442_v25  ;;  %v673_v61 = vpop.permute.xlu0 %672 }
 0x2b4   :  { %v688_v7 = vpop.permute.xlu1 %687 }
 0x2b5   :  { %v683_v9 = vpop.permute.xlu0 %682 }
 0x2b6   :  { %v979_v26 = vpop.eup %978 }
 0x2b7   :  { %v981_v27 = vpop.eup %980 }
 0x2b8   :  { %v942_v28 = vpack.c.bf16 %v979_v26, %v981_v27 }
 0x2b9   :  { %v778_v19 = vpop.permute.xlu0 %777 }
 0x2ba   :  { %v983_v29 = vpop.eup %982  ;;  %943 = vmatprep.subr.bf16.mxu1 %v942_v28  ;;  %v779_v23 = vrot.slane %v778_v19, 7 }
 0x2bb   :  { %v1186_v30 = vpop.eup %984  ;;  %945 = vmatpush3.bf16.msra.mxu1 %v942_v28 }
 0x2bc   :  { %v946_v31 = vpack.c.bf16 %v983_v29, %v1186_v30 }
 0x2be   :  { %947 = vmatprep.subr.bf16.mxu1 %v946_v31 }
 0x2bf   :  { %949 = vmatpush3.bf16.msra.mxu1 %v946_v31 }
 0x2c0   :  { %958 = vmatprep.subr.bf16.mxu1 %v1003_v57 }
 0x2c2   :  { %896 = vmatmul.mubr.msk.f32.vlgmr.msra.gmra.mrb[4].mxu1 %vm217_vm2, %v45_v32 }
 0x2c3   :  { %898 = vmatprep.mubr.msk.f32.mxu1 %vm217_vm2, %v46_v33 }
 0x2c6   :  { %899 = vmatmul.mubr.msk.f32.gmra.mrb[6].mxu1 %vm217_vm2, %v47_v34 }
 0x2c7   :  { %923 = vmatprep.mubr.msk.f32.mxu1 %vm1004_vm3, %v1005_v58 }
 0x395   :  { %v897_v38 = vpop.f32.mrb[4].mxu1 }
 0x396   :  { %v552_v39 = vadd.f32 %v897_v38, %v456_v36  ;;  %v546_v40 = vpop.f32.mrb[5].mxu1 }
 0x397   :  { %v547_v41 = vadd.f32 %v546_v40, %v451_v37 }
 0x398   :  { %986 = vtanh.f32 %v552_v39 }
 0x399   :  { %988 = vtanh.f32 %v547_v41  ;;  %v900_v43 = vpop.f32.mrb[6].mxu1 }
 0x39a   :  { %v562_v45 = vadd.f32 %v900_v43, %v466_v42  ;;  %v556_v46 = vpop.f32.mrb[7].mxu1 }
 0x39b   :  { %v557_v47 = vadd.f32 %v556_v46, %v461_v44 }
 0x39c   :  { %990 = vtanh.f32 %v562_v45 }
 0x39d   :  { %992 = vtanh.f32 %v557_v47 }
 0x3a2   :  { %v987_v48 = vpop.eup %986 }
 0x3a3   :  { %v989_v49 = vpop.eup %988 }
 0x3a4   :  { %v950_v50 = vpack.c.bf16 %v987_v48, %v989_v49 }
 0x3a6   :  { %v991_v51 = vpop.eup %990  ;;  %951 = vmatprep.subr.bf16.mxu0 %v950_v50 }
 0x3a7   :  { %v993_v52 = vpop.eup %992  ;;  %953 = vmatpush3.bf16.msra.mxu0 %v950_v50 }
 0x3a8   :  { %v954_v53 = vpack.c.bf16 %v991_v51, %v993_v52 }
 0x3aa   :  { %955 = vmatprep.subr.bf16.mxu0 %v954_v53 }
 0x3ab   :  { %957 = vmatpush3.bf16.msra.mxu0 %v954_v53 }
 0x3ae   :  { %910 = vmatmul.mubr.msk.f32.vlgmr.msra.gmra.mrb[8].mxu0 %vm217_vm2, %v49_v54 }
 0x3af   :  { %912 = vmatprep.mubr.msk.f32.mxu0 %vm217_vm2, %v50_v55 }
 0x3b2   :  { %913 = vmatmul.mubr.msk.f32.gmra.mrb[10].mxu0 %vm217_vm2, %v51_v56 }
 0x481   :  { %v911_v60 = vpop.f32.mrb[8].mxu0 }
 0x482   :  { %v667_v62 = vadd.f32 %v979_v26, %v911_v60  ;;  %v647_v63 = vpop.f32.mrb[9].mxu0 }
 0x483   :  { %v666_v0 = vadd.f32 %v981_v27, %v647_v63 }
 0x484   :  { %v691_v2 = vadd.f32 %v678_v59, %v667_v62 }
 0x485   :  { %v690_v3 = vadd.f32 %v673_v61, %v666_v0  ;;  %v914_v4 = vpop.f32.mrb[10].mxu0 }
 0x486   :  { %994 = vtanh.f32 %v691_v2  ;;  %v669_v5 = vadd.f32 %v983_v29, %v914_v4  ;;  %v657_v6 = vpop.f32.mrb[11].mxu0 }
 0x487   :  { %996 = vtanh.f32 %v690_v3  ;;  %v668_v8 = vadd.f32 %v1186_v30, %v657_v6 }
 0x488   :  { %v693_v10 = vadd.f32 %v688_v7, %v669_v5 }
 0x489   :  { %v692_v11 = vadd.f32 %v683_v9, %v668_v8 }
 0x48a   :  { %998 = vtanh.f32 %v693_v10 }
 0x48b   :  { %1000 = vtanh.f32 %v692_v11 }
 0x490   :  { %v995_v12 = vpop.eup %994 }
 0x491   :  { %v997_v13 = vpop.eup %996 }
 0x492   :  { %v959_v14 = vpack.c.bf16 %v995_v12, %v997_v13 }
 0x494   :  { %v999_v15 = vpop.eup %998  ;;  %960 = vmatpush3.bf16.msra.mxu1 %v959_v14 }
 0x495   :  { %v1001_v16 = vpop.eup %1000  ;;  %961 = vmatprep.subr.bf16.mxu1 %v1003_v57 }
 0x496   :  { %v962_v17 = vpack.c.bf16 %v999_v15, %v1001_v16 }
 0x498   :  { %963 = vmatpush3.bf16.msra.mxu1 %v962_v17 }
 0x49b   :  { %924 = vmatmul.mubr.msk.f32.vlgmr.msra.gmra.mrb[8].mxu1 %vm217_vm2, %v68_v18 }
 0x56e   :  { %v767_v20 = vpop.f32.mrb[8].mxu1 }
 0x56f   :  { %v772_v21 = vrot.slane %v767_v20, 7  ;;  %v925_v22 = vpop.f32.mrb[9].mxu1 }
 0x571   :  { %v774_v24 = vadd.f32 %v772_v21, %v1052_v1 }
 0x573   :  { %v781_v25 = vadd.f32 %v779_v23, %v774_v24 }
 0x575   :  { %782 = vst [vmem:[%s1227_s7] sm:$0x6] %v781_v25 }

</bundles_post_ra>
